<compile_context>
chip_gen: v7x
topology: tpu7x:2x2x1
jax: 0.10.0
libtpu: 0.0.40
codegen_flags: <defaults>
</compile_context>

<pallas_src>
import functools

import jax
import jax.numpy as jnp
from jax import lax
from jax.experimental import pallas as pl
from jax.experimental.pallas import tpu as pltpu


def _basic_block_kernel(x_ref, pprev_ref, pnext_ref, wt1_ref, wt2_ref, gmat_ref,
                        g1_ref, b1_ref, g2_ref, b2_ref, o_ref, *, N, H, W, C):
    eps = 1e-5
    inv_m = 1.0 / float(N * H * W)

    x = x_ref[...]            # (N*H, W*C) lane-dense activations
    pprev = pprev_ref[...]    # (N*H, N*H): row r <- row r-1 within the same image, else 0
    pnext = pnext_ref[...]    # (N*H, N*H): row r <- row r+1 within the same image, else 0
    gmat = gmat_ref[...]      # (W*C, W*C): per-channel pooling / re-tiling matrix

    def conv3x3(a, wt):
        # Vertical taps via two tiny MXU shift-matmuls (boundary zeros baked into
        # pprev/pnext); horizontal taps + channel mixing are baked into the
        # block-Toeplitz weight wt, so the conv is a single lane-dense matmul with a
        # lane-dense (N*H, W*C) result -- no padded scratch, no im2col, no reshapes.
        a_prev = jnp.dot(pprev, a, preferred_element_type=jnp.float32)
        a_next = jnp.dot(pnext, a, preferred_element_type=jnp.float32)
        patches = jnp.concatenate([a_prev, a, a_next], axis=1)            # (N*H, 3*W*C)
        return jnp.dot(patches, wt, preferred_element_type=jnp.float32)   # (N*H, W*C)

    def bn(acc, g_lane, b_lane):
        # Training-mode BN (biased variance).  acc @ gmat produces, in every lane
        # w*C+c, the per-row sum of channel c over all w (MXU does the cross-lane
        # pooling AND the re-tiling across W); only a 32-row sublane sum remains.
        chan_sum = jnp.sum(jnp.dot(acc, gmat, preferred_element_type=jnp.float32),
                           axis=0, keepdims=True)                          # (1, W*C)
        chan_sumsq = jnp.sum(jnp.dot(acc * acc, gmat, preferred_element_type=jnp.float32),
                             axis=0, keepdims=True)                        # (1, W*C)
        mean = chan_sum * inv_m
        var = jnp.maximum(chan_sumsq * inv_m - mean * mean, 0.0)           # clamp cancellation
        scale = g_lane * lax.rsqrt(var + eps)
        shift = b_lane - mean * scale
        return acc * scale + shift

    # conv1 -> bn1 -> relu          (all (N*H, W*C) lane-dense, full 128-lane vregs)
    y1 = jnp.maximum(bn(conv3x3(x, wt1_ref[...]), g1_ref[...], b1_ref[...]), 0.0)
    # conv2 -> bn2 -> residual add -> unmasked full-lane store
    y2 = bn(conv3x3(y1, wt2_ref[...]), g2_ref[...], b2_ref[...])
    o_ref[...] = (y2 + x).astype(o_ref.dtype)


# ---------------- host-side constant builders (pure jnp, one-time cost) ----------------

def _toeplitz_weight(w_oihw, W, C):
    """OIHW 3x3 conv weight -> (3*W*C, W*C) block-Toeplitz matrix.

    Row block kh pairs with input row h+kh-1; within a block,
    T[w_in*C+ci, w_out*C+co] = w[kh, w_in-w_out+1, ci, co] for |w_in-w_out| <= 1,
    zeros elsewhere encode the horizontal zero-padding."""
    w = jnp.transpose(w_oihw, (2, 3, 1, 0)).astype(jnp.float32)   # (kh, kw, ci, co)
    blocks = []
    for kh in range(3):
        t = jnp.zeros((W * C, W * C), jnp.float32)
        for dx in (-1, 0, 1):
            band = jnp.eye(W, k=-dx, dtype=jnp.float32)           # ones at (w_out+dx, w_out)
            t = t + jnp.einsum('IJ,ab->IaJb', band, w[kh, dx + 1]).reshape(W * C, W * C)
        blocks.append(t)
    return jnp.concatenate(blocks, axis=0)                        # (3*W*C, W*C)


def _row_shift_matrix(N, H, delta):
    """(N*H, N*H) matrix P with (P @ X)[r] = X[r+delta] within the same image, else 0."""
    NH = N * H
    r = jnp.arange(NH)
    h = r % H
    valid = ((h + delta >= 0) & (h + delta < H)).astype(jnp.float32)
    cols = jnp.clip(r + delta, 0, NH - 1)
    return jnp.zeros((NH, NH), jnp.float32).at[r, cols].set(valid)


def _channel_pool_matrix(W, C):
    """(W*C, W*C) matrix G with (v @ G)[w*C+c] = sum_{w'} v[w'*C+c]."""
    lane = jnp.arange(W * C)
    return (lane[:, None] % C == lane[None, :] % C).astype(jnp.float32)


def basic_block_forward(x_nchw, w1_oihw, w2_oihw, g1, b1, g2, b2):
    """x_nchw: (N, C, H, W); conv weights in PyTorch OIHW layout."""
    N, Cin, H, W = x_nchw.shape
    C = w1_oihw.shape[0]
    assert Cin == C, "stride=1 / no-downsample BasicBlock requires inplanes == planes"
    NH, WC = N * H, W * C

    # Lane-dense (N*H, W*C) activation layout (NHWC flatten); W*C == 128 for the test shape.
    x_flat = jnp.transpose(x_nchw, (0, 2, 3, 1)).astype(jnp.float32).reshape(NH, WC)
    wt1 = _toeplitz_weight(w1_oihw, W, C)
    wt2 = _toeplitz_weight(w2_oihw, W, C)
    pprev = _row_shift_matrix(N, H, -1)
    pnext = _row_shift_matrix(N, H, +1)
    gmat = _channel_pool_matrix(W, C)
    g1l = jnp.tile(g1.astype(jnp.float32).reshape(1, C), (1, W))   # per-lane gamma/beta
    b1l = jnp.tile(b1.astype(jnp.float32).reshape(1, C), (1, W))
    g2l = jnp.tile(g2.astype(jnp.float32).reshape(1, C), (1, W))
    b2l = jnp.tile(b2.astype(jnp.float32).reshape(1, C), (1, W))

    kernel = functools.partial(_basic_block_kernel, N=N, H=H, W=W, C=C)
    vmem = pl.BlockSpec(memory_space=pltpu.MemorySpace.VMEM)
    out_flat = pl.pallas_call(
        kernel,
        out_shape=jax.ShapeDtypeStruct((NH, WC), jnp.float32),
        in_specs=[vmem] * 10,
        out_specs=vmem,
    )(x_flat, pprev, pnext, wt1, wt2, gmat, g1l, b1l, g2l, b2l)

    return jnp.transpose(out_flat.reshape(N, H, W, C), (0, 3, 1, 2))


def _reference_basic_block(x, w1, w2, g1, b1, g2, b2):
    """Pure-JAX/XLA reference (NCHW), mirroring the PyTorch forward (train-mode BN)."""
    eps = 1e-5

    def bn(o, g, b):
        m = jnp.mean(o, axis=(0, 2, 3), keepdims=True)
        v = jnp.mean((o - m) ** 2, axis=(0, 2, 3), keepdims=True)
        return (o - m) * lax.rsqrt(v + eps) * g.reshape(1, -1, 1, 1) + b.reshape(1, -1, 1, 1)

    def conv(a, w):
        return lax.conv_general_dilated(a, w, (1, 1), ((1, 1), (1, 1)),
                                        dimension_numbers=('NCHW', 'OIHW', 'NCHW'))

    out = jnp.maximum(bn(conv(x, w1), g1, b1), 0.0)
    out = bn(conv(out, w2), g2, b2)
    return out + x


if __name__ == "__main__":
    # Small shapes consistent with the module (stride=1, inplanes == planes).
    # W*C = 128 so each flat activation row is exactly one lane-width wide.
    N, C, H, W = 2, 8, 16, 16

    key = jax.random.PRNGKey(0)
    k_x, k_w1, k_w2 = jax.random.split(key, 3)
    x = jax.random.normal(k_x, (N, C, H, W), dtype=jnp.float32)
    w1 = 0.1 * jax.random.normal(k_w1, (C, C, 3, 3), dtype=jnp.float32)   # conv1: OIHW
    w2 = 0.1 * jax.random.normal(k_w2, (C, C, 3, 3), dtype=jnp.float32)   # conv2: OIHW
    g1 = jnp.ones((C,), jnp.float32)   # BatchNorm2d default init: weight=1, bias=0
    b1 = jnp.zeros((C,), jnp.float32)
    g2 = jnp.ones((C,), jnp.float32)
    b2 = jnp.zeros((C,), jnp.float32)

    out = jax.block_until_ready(basic_block_forward(x, w1, w2, g1, b1, g2, b2))

    ref = _reference_basic_block(x, w1, w2, g1, b1, g2, b2)
    assert out.shape == (N, C, H, W)
    assert jnp.allclose(out, ref, rtol=1e-3, atol=1e-3), \
        f"max abs err {jnp.max(jnp.abs(out - ref))}"

    print("KERNEL_OK")
</pallas_src>

<mosaic_0001>
module attributes {stable_mosaic.version = 11 : i64} {
  func.func @_basic_block_kernel(%arg0: memref<32x128xf32, #tpu.memory_space<vmem>>, %arg1: memref<32x32xf32, #tpu.memory_space<vmem>>, %arg2: memref<32x32xf32, #tpu.memory_space<vmem>>, %arg3: memref<384x128xf32, #tpu.memory_space<vmem>>, %arg4: memref<384x128xf32, #tpu.memory_space<vmem>>, %arg5: memref<128x128xf32, #tpu.memory_space<vmem>>, %arg6: memref<1x128xf32, #tpu.memory_space<vmem>>, %arg7: memref<1x128xf32, #tpu.memory_space<vmem>>, %arg8: memref<1x128xf32, #tpu.memory_space<vmem>>, %arg9: memref<1x128xf32, #tpu.memory_space<vmem>>, %arg10: memref<32x128xf32, #tpu.memory_space<vmem>>) attributes {dimension_semantics = [], scalar_prefetch = 0 : i64, scratch_operands = 0 : i64, tpu.core_type = #tpu.core_type<tc>} {
    %c0 = arith.constant 0 : index
    %c0_0 = arith.constant 0 : index
    %0 = vector.load %arg0[%c0, %c0_0] : memref<32x128xf32, #tpu.memory_space<vmem>>, vector<32x128xf32>
    %c0_1 = arith.constant 0 : index
    %c0_2 = arith.constant 0 : index
    %1 = vector.load %arg1[%c0_1, %c0_2] : memref<32x32xf32, #tpu.memory_space<vmem>>, vector<32x32xf32>
    %c0_3 = arith.constant 0 : index
    %c0_4 = arith.constant 0 : index
    %2 = vector.load %arg2[%c0_3, %c0_4] : memref<32x32xf32, #tpu.memory_space<vmem>>, vector<32x32xf32>
    %c0_5 = arith.constant 0 : index
    %c0_6 = arith.constant 0 : index
    %3 = vector.load %arg5[%c0_5, %c0_6] : memref<128x128xf32, #tpu.memory_space<vmem>>, vector<128x128xf32>
    %c0_7 = arith.constant 0 : index
    %c0_8 = arith.constant 0 : index
    %4 = vector.load %arg3[%c0_7, %c0_8] : memref<384x128xf32, #tpu.memory_space<vmem>>, vector<384x128xf32>
    %cst = arith.constant dense<0.000000e+00> : vector<32x128xf32>
    %5 = tpu.matmul %1, %0, %cst {dimension_numbers = #tpu.dot_dimension_numbers<[1], [0], [0], [1], [0, 0, 1, 1], [], []>} : vector<32x32xf32>, vector<32x128xf32>, vector<32x128xf32> -> vector<32x128xf32>
    %cst_9 = arith.constant dense<0.000000e+00> : vector<32x128xf32>
    %6 = tpu.matmul %2, %0, %cst_9 {dimension_numbers = #tpu.dot_dimension_numbers<[1], [0], [0], [1], [0, 0, 1, 1], [], []>} : vector<32x32xf32>, vector<32x128xf32>, vector<32x128xf32> -> vector<32x128xf32>
    %7 = tpu.concatenate %5, %0, %6 in 1 : vector<32x128xf32>, vector<32x128xf32>, vector<32x128xf32> -> vector<32x384xf32>
    %cst_10 = arith.constant dense<0.000000e+00> : vector<32x128xf32>
    %8 = tpu.matmul %7, %4, %cst_10 {dimension_numbers = #tpu.dot_dimension_numbers<[1], [0], [0], [1], [0, 0, 1, 1], [], []>} : vector<32x384xf32>, vector<384x128xf32>, vector<32x128xf32> -> vector<32x128xf32>
    %c0_11 = arith.constant 0 : index
    %c0_12 = arith.constant 0 : index
    %9 = vector.load %arg6[%c0_11, %c0_12] : memref<1x128xf32, #tpu.memory_space<vmem>>, vector<1x128xf32>
    %c0_13 = arith.constant 0 : index
    %c0_14 = arith.constant 0 : index
    %10 = vector.load %arg7[%c0_13, %c0_14] : memref<1x128xf32, #tpu.memory_space<vmem>>, vector<1x128xf32>
    %cst_15 = arith.constant dense<0.000000e+00> : vector<32x128xf32>
    %11 = tpu.matmul %8, %3, %cst_15 {dimension_numbers = #tpu.dot_dimension_numbers<[1], [0], [0], [1], [0, 0, 1, 1], [], []>} : vector<32x128xf32>, vector<128x128xf32>, vector<32x128xf32> -> vector<32x128xf32>
    %cst_16 = arith.constant dense<0.000000e+00> : vector<128xf32>
    %12 = vector.multi_reduction <add>, %11, %cst_16 [0] : vector<32x128xf32> to vector<128xf32>
    %13 = vector.shape_cast %12 : vector<128xf32> to vector<1x128xf32>
    %14 = arith.mulf %8, %8 : vector<32x128xf32>
    %cst_17 = arith.constant dense<0.000000e+00> : vector<32x128xf32>
    %15 = tpu.matmul %14, %3, %cst_17 {dimension_numbers = #tpu.dot_dimension_numbers<[1], [0], [0], [1], [0, 0, 1, 1], [], []>} : vector<32x128xf32>, vector<128x128xf32>, vector<32x128xf32> -> vector<32x128xf32>
    %cst_18 = arith.constant dense<0.000000e+00> : vector<128xf32>
    %16 = vector.multi_reduction <add>, %15, %cst_18 [0] : vector<32x128xf32> to vector<128xf32>
    %17 = vector.shape_cast %16 : vector<128xf32> to vector<1x128xf32>
    %cst_19 = arith.constant 0.001953125 : f32
    %18 = vector.broadcast %cst_19 : f32 to vector<1x128xf32>
    %19 = arith.mulf %13, %18 : vector<1x128xf32>
    %cst_20 = arith.constant 0.001953125 : f32
    %20 = vector.broadcast %cst_20 : f32 to vector<1x128xf32>
    %21 = arith.mulf %17, %20 : vector<1x128xf32>
    %22 = arith.mulf %19, %19 : vector<1x128xf32>
    %23 = arith.subf %21, %22 : vector<1x128xf32>
    %cst_21 = arith.constant 0.000000e+00 : f32
    %24 = vector.broadcast %cst_21 : f32 to vector<1x128xf32>
    %25 = arith.maximumf %23, %24 : vector<1x128xf32>
    %cst_22 = arith.constant 9.99999974E-6 : f32
    %26 = vector.broadcast %cst_22 : f32 to vector<1x128xf32>
    %27 = arith.addf %25, %26 : vector<1x128xf32>
    %28 = math.rsqrt %27 : vector<1x128xf32>
    %29 = arith.mulf %9, %28 : vector<1x128xf32>
    %30 = arith.mulf %19, %29 : vector<1x128xf32>
    %31 = arith.subf %10, %30 : vector<1x128xf32>
    %32 = vector.broadcast %29 : vector<1x128xf32> to vector<32x128xf32>
    %33 = arith.mulf %8, %32 : vector<32x128xf32>
    %34 = vector.broadcast %31 : vector<1x128xf32> to vector<32x128xf32>
    %35 = arith.addf %33, %34 : vector<32x128xf32>
    %cst_23 = arith.constant 0.000000e+00 : f32
    %36 = vector.broadcast %cst_23 : f32 to vector<32x128xf32>
    %37 = arith.maximumf %35, %36 : vector<32x128xf32>
    %c0_24 = arith.constant 0 : index
    %c0_25 = arith.constant 0 : index
    %38 = vector.load %arg4[%c0_24, %c0_25] : memref<384x128xf32, #tpu.memory_space<vmem>>, vector<384x128xf32>
    %cst_26 = arith.constant dense<0.000000e+00> : vector<32x128xf32>
    %39 = tpu.matmul %1, %37, %cst_26 {dimension_numbers = #tpu.dot_dimension_numbers<[1], [0], [0], [1], [0, 0, 1, 1], [], []>} : vector<32x32xf32>, vector<32x128xf32>, vector<32x128xf32> -> vector<32x128xf32>
    %cst_27 = arith.constant dense<0.000000e+00> : vector<32x128xf32>
    %40 = tpu.matmul %2, %37, %cst_27 {dimension_numbers = #tpu.dot_dimension_numbers<[1], [0], [0], [1], [0, 0, 1, 1], [], []>} : vector<32x32xf32>, vector<32x128xf32>, vector<32x128xf32> -> vector<32x128xf32>
    %41 = tpu.concatenate %39, %37, %40 in 1 : vector<32x128xf32>, vector<32x128xf32>, vector<32x128xf32> -> vector<32x384xf32>
    %cst_28 = arith.constant dense<0.000000e+00> : vector<32x128xf32>
    %42 = tpu.matmul %41, %38, %cst_28 {dimension_numbers = #tpu.dot_dimension_numbers<[1], [0], [0], [1], [0, 0, 1, 1], [], []>} : vector<32x384xf32>, vector<384x128xf32>, vector<32x128xf32> -> vector<32x128xf32>
    %c0_29 = arith.constant 0 : index
    %c0_30 = arith.constant 0 : index
    %43 = vector.load %arg8[%c0_29, %c0_30] : memref<1x128xf32, #tpu.memory_space<vmem>>, vector<1x128xf32>
    %c0_31 = arith.constant 0 : index
    %c0_32 = arith.constant 0 : index
    %44 = vector.load %arg9[%c0_31, %c0_32] : memref<1x128xf32, #tpu.memory_space<vmem>>, vector<1x128xf32>
    %cst_33 = arith.constant dense<0.000000e+00> : vector<32x128xf32>
    %45 = tpu.matmul %42, %3, %cst_33 {dimension_numbers = #tpu.dot_dimension_numbers<[1], [0], [0], [1], [0, 0, 1, 1], [], []>} : vector<32x128xf32>, vector<128x128xf32>, vector<32x128xf32> -> vector<32x128xf32>
    %cst_34 = arith.constant dense<0.000000e+00> : vector<128xf32>
    %46 = vector.multi_reduction <add>, %45, %cst_34 [0] : vector<32x128xf32> to vector<128xf32>
    %47 = vector.shape_cast %46 : vector<128xf32> to vector<1x128xf32>
    %48 = arith.mulf %42, %42 : vector<32x128xf32>
    %cst_35 = arith.constant dense<0.000000e+00> : vector<32x128xf32>
    %49 = tpu.matmul %48, %3, %cst_35 {dimension_numbers = #tpu.dot_dimension_numbers<[1], [0], [0], [1], [0, 0, 1, 1], [], []>} : vector<32x128xf32>, vector<128x128xf32>, vector<32x128xf32> -> vector<32x128xf32>
    %cst_36 = arith.constant dense<0.000000e+00> : vector<128xf32>
    %50 = vector.multi_reduction <add>, %49, %cst_36 [0] : vector<32x128xf32> to vector<128xf32>
    %51 = vector.shape_cast %50 : vector<128xf32> to vector<1x128xf32>
    %cst_37 = arith.constant 0.001953125 : f32
    %52 = vector.broadcast %cst_37 : f32 to vector<1x128xf32>
    %53 = arith.mulf %47, %52 : vector<1x128xf32>
    %cst_38 = arith.constant 0.001953125 : f32
    %54 = vector.broadcast %cst_38 : f32 to vector<1x128xf32>
    %55 = arith.mulf %51, %54 : vector<1x128xf32>
    %56 = arith.mulf %53, %53 : vector<1x128xf32>
    %57 = arith.subf %55, %56 : vector<1x128xf32>
    %cst_39 = arith.constant 0.000000e+00 : f32
    %58 = vector.broadcast %cst_39 : f32 to vector<1x128xf32>
    %59 = arith.maximumf %57, %58 : vector<1x128xf32>
    %cst_40 = arith.constant 9.99999974E-6 : f32
    %60 = vector.broadcast %cst_40 : f32 to vector<1x128xf32>
    %61 = arith.addf %59, %60 : vector<1x128xf32>
    %62 = math.rsqrt %61 : vector<1x128xf32>
    %63 = arith.mulf %43, %62 : vector<1x128xf32>
    %64 = arith.mulf %53, %63 : vector<1x128xf32>
    %65 = arith.subf %44, %64 : vector<1x128xf32>
    %66 = vector.broadcast %63 : vector<1x128xf32> to vector<32x128xf32>
    %67 = arith.mulf %42, %66 : vector<32x128xf32>
    %68 = vector.broadcast %65 : vector<1x128xf32> to vector<32x128xf32>
    %69 = arith.addf %67, %68 : vector<32x128xf32>
    %70 = arith.addf %69, %0 : vector<32x128xf32>
    %c0_41 = arith.constant 0 : index
    %c0_42 = arith.constant 0 : index
    %71 = vector.load %arg10[%c0_41, %c0_42] : memref<32x128xf32, #tpu.memory_space<vmem>>, vector<32x128xf32>
    tpu.vector_store %arg10[%c0_41, %c0_42], %70 {strides = array<i32>} : memref<32x128xf32, #tpu.memory_space<vmem>>, vector<32x128xf32>,
    return
  }
}

</mosaic_0001>

<bundles_post_ra>
// kernel: tpu_custom_call.1
= control target key start
LH: loop header
LB: loop body
LE: loop exit
PB: predicated region body
PF: predicated region fallthrough
CT: control target
= control target key end

     0   :  { %15 = vsyncpa [#allocation3], 0  ;;  %s2827_s0 = inlined_call_operand.hbm [shape: f32[32,128], index: 0, kind: input, shape index: {}]   ;;  %s2828_s1 = inlined_call_operand.hbm [shape: f32[32,32], index: 1, kind: input, shape index: {}]   ;;  %s2829_s2 = inlined_call_operand.hbm [shape: f32[32,32], index: 2, kind: input, shape index: {}]   ;;  %s2830_s3 = inlined_call_operand.hbm [shape: f32[384,128], index: 3, kind: input, shape index: {}]   ;;  %s2831_s4 = inlined_call_operand.hbm [shape: f32[384,128], index: 4, kind: input, shape index: {}]   ;;  %s2832_s5 = inlined_call_operand.hbm [shape: f32[128,128], index: 5, kind: input, shape index: {}]   ;;  %s2833_s6 = inlined_call_operand.vmem [shape: f32[1,128], index: 6, kind: input, shape index: {}]   ;;  %s2834_s7 = inlined_call_operand.vmem [shape: f32[1,128], index: 7, kind: input, shape index: {}]   ;;  %s2835_s8 = inlined_call_operand.vmem [shape: f32[1,128], index: 8, kind: input, shape index: {}]   ;;  %s2836_s9 = inlined_call_operand.vmem [shape: f32[1,128], index: 9, kind: input, shape index: {}]   ;;  %s2837_s10 = inlined_call_operand.hbm [shape: f32[32,128], index: 10, kind: output, shape index: {}]  }
   0x1   :  { %16 = vsyncpa [#allocation6], 0 }
   0x2   :  { %17 = vsyncpa [#allocation9], 0 }
   0x3   :  { %18 = vsyncpa [#allocation12], 0 }
   0x4   :  { %19 = vsyncpa [#allocation4], 0  ;;  %s2436_s13 = smov [#allocation5]   ;;  %s2437_s15 = smov [#allocation8]  }
   0x5   :  { %s37_s14 = sshll.u32 %s2436_s13, 4  ;;  %s61_s16 = sshll.u32 %s2437_s15, 4  ;;  %s38_s14 = int_to_ptr.vmem [resolvable:$true] %s37_s14  ;;  %s2500_s16 = int_to_ptr.vmem [resolvable:$true] %s61_s16 }
   0x6   :  { %s2272_s19 = scalar_lea.hbm %s2828_s1, 512 }
   0x7   :  { %p2273_p0 = scmp.ne.s32.totalorder %s2828_s1, %s2272_s19  ;;  %p2276_p1 = scmp.lt.u32.totalorder %s2272_s19, %s2828_s1 }
   0x9   :  { %p2278_p2 = pnand %p2276_p1, %p2273_p0 }
   0xb   :  { %2281 = shalt.err (!%p2278_p2)
}
   0xc   :  { %s2282_s24 = scalar_lea.vmem %s38_s14, 512  ;;  %p2287_p4 = scmp.lt.s32.totalorder %s38_s14, %s38_s14 }
   0xd   :  { %p2283_p3 = scmp.ne.s32.totalorder %s38_s14, %s2282_s24  ;;  %p2288_p5 = scmp.lt.s32.totalorder %s2282_s24, %s2282_s24 }
   0xf   :  { %p2289_p6 = por %p2288_p5, %p2287_p4 }
  0x11   :  { %p2290_p7 = pnand %p2289_p6, %p2283_p3 }
  0x13   :  { %2293 = shalt.err (!%p2290_p7)
}
  0x14   :  { %s2438_s25 = smov 128   ;;  %s2439_s26 = smov 8  }
  0x15   :  { %43 = dma.hbm_to_vmem [thread:$0]  %s2828_s1, 512, %s38_s14, [#allocation6], %s2438_s25, %s2438_s25, %s2439_s26  }
  0x16   :  { %s2294_s11 = scalar_lea.hbm %s2830_s3, 6144 }
  0x17   :  { %p2295_p8 = scmp.ne.s32.totalorder %s2830_s3, %s2294_s11  ;;  %p2298_p9 = scmp.lt.u32.totalorder %s2294_s11, %s2830_s3 }
  0x19   :  { %p2300_p10 = pnand %p2298_p9, %p2295_p8 }
  0x1b   :  { %2303 = shalt.err (!%p2300_p10)
}
  0x1c   :  { %s2304_s18 = scalar_lea.vmem %s2500_s16, 6144  ;;  %p2309_p12 = scmp.lt.s32.totalorder %s2500_s16, %s2500_s16 }
  0x1d   :  { %p2305_p11 = scmp.ne.s32.totalorder %s2500_s16, %s2304_s18  ;;  %p2310_p13 = scmp.lt.s32.totalorder %s2304_s18, %s2304_s18 }
  0x1f   :  { %p2311_p0 = por %p2310_p13, %p2309_p12 }
  0x21   :  { %p2312_p1 = pnand %p2311_p0, %p2305_p11 }
  0x23   :  { %2315 = shalt.err (!%p2312_p1)
}
  0x24   :  { %67 = dma.hbm_to_vmem [thread:$0]  %s2830_s3, 6144, %s2500_s16, [#allocation9], %s2438_s25, %s2438_s25, %s2439_s26  }
  0x25   :  { %s2440_s19 = smov [#allocation2]   ;;  %s2441_s21 = smov [#allocation7]  }
  0x26   :  { %s25_s20 = sshll.u32 %s2440_s19, 4  ;;  %s49_s22 = sshll.u32 %s2441_s21, 4  ;;  %s26_s20 = int_to_ptr.vmem [resolvable:$true] %s25_s20  ;;  %s2537_s22 = int_to_ptr.vmem [resolvable:$true] %s49_s22 }
  0x27   :  { %s2316_s27 = scalar_lea.hbm %s2827_s0, 512 }
  0x28   :  { %p2317_p2 = scmp.ne.s32.totalorder %s2827_s0, %s2316_s27  ;;  %p2320_p3 = scmp.lt.u32.totalorder %s2316_s27, %s2827_s0 }
  0x2a   :  { %p2322_p4 = pnand %p2320_p3, %p2317_p2 }
  0x2c   :  { %2325 = shalt.err (!%p2322_p4)
}
  0x2d   :  { %s2326_s3 = scalar_lea.vmem %s26_s20, 512  ;;  %p2331_p6 = scmp.lt.s32.totalorder %s26_s20, %s26_s20 }
  0x2e   :  { %p2327_p5 = scmp.ne.s32.totalorder %s26_s20, %s2326_s3  ;;  %p2332_p7 = scmp.lt.s32.totalorder %s2326_s3, %s2326_s3 }
  0x30   :  { %p2333_p8 = por %p2332_p7, %p2331_p6 }
  0x32   :  { %p2334_p9 = pnand %p2333_p8, %p2327_p5 }
  0x34   :  { %2337 = shalt.err (!%p2334_p9)
}
  0x35   :  { %31 = dma.hbm_to_vmem [thread:$0]  %s2827_s0, 512, %s26_s20, [#allocation3], %s2438_s25, %s2438_s25, %s2439_s26  }
  0x36   :  { %s2338_s17 = scalar_lea.hbm %s2829_s2, 512 }
  0x37   :  { %p2339_p10 = scmp.ne.s32.totalorder %s2829_s2, %s2338_s17  ;;  %p2342_p11 = scmp.lt.u32.totalorder %s2338_s17, %s2829_s2 }
  0x39   :  { %p2344_p12 = pnand %p2342_p11, %p2339_p10 }
  0x3b   :  { %2347 = shalt.err (!%p2344_p12)
}
  0x3c   :  { %s2348_s21 = scalar_lea.vmem %s2537_s22, 512  ;;  %p2353_p0 = scmp.lt.s32.totalorder %s2537_s22, %s2537_s22 }
  0x3d   :  { %p2349_p13 = scmp.ne.s32.totalorder %s2537_s22, %s2348_s21  ;;  %p2354_p1 = scmp.lt.s32.totalorder %s2348_s21, %s2348_s21 }
  0x3f   :  { %p2355_p2 = por %p2354_p1, %p2353_p0 }
  0x41   :  { %p2356_p3 = pnand %p2355_p2, %p2349_p13 }
  0x43   :  { %2359 = shalt.err (!%p2356_p3)
}
  0x44   :  { %55 = dma.hbm_to_vmem [thread:$0]  %s2829_s2, 512, %s2537_s22, [#allocation6], %s2438_s25, %s2438_s25, %s2439_s26  }
  0x45   :  { %s2442_s23 = smov [#allocation10]   ;;  %s2443_s27 = smov [#allocation11]  }
  0x46   :  { %s73_s24 = sshll.u32 %s2442_s23, 4  ;;  %s85_s28 = sshll.u32 %s2443_s27, 4  ;;  %s74_s24 = int_to_ptr.vmem [resolvable:$true] %s73_s24  ;;  %s2574_s28 = int_to_ptr.vmem [resolvable:$true] %s85_s28 }
  0x47   :  { %s2360_s11 = scalar_lea.hbm %s2831_s4, 6144 }
  0x48   :  { %p2361_p4 = scmp.ne.s32.totalorder %s2831_s4, %s2360_s11  ;;  %p2364_p5 = scmp.lt.u32.totalorder %s2360_s11, %s2831_s4 }
  0x4a   :  { %p2366_p6 = pnand %p2364_p5, %p2361_p4 }
  0x4c   :  { %2369 = shalt.err (!%p2366_p6)
}
  0x4d   :  { %s2370_s2 = scalar_lea.vmem %s74_s24, 6144  ;;  %p2375_p8 = scmp.lt.s32.totalorder %s74_s24, %s74_s24 }
  0x4e   :  { %p2371_p7 = scmp.ne.s32.totalorder %s74_s24, %s2370_s2  ;;  %p2376_p9 = scmp.lt.s32.totalorder %s2370_s2, %s2370_s2 }
  0x50   :  { %p2377_p10 = por %p2376_p9, %p2375_p8 }
  0x52   :  { %p2378_p11 = pnand %p2377_p10, %p2371_p7 }
  0x54   :  { %2381 = shalt.err (!%p2378_p11)
}
  0x55   :  { %79 = dma.hbm_to_vmem [thread:$0]  %s2831_s4, 6144, %s74_s24, [#allocation9], %s2438_s25, %s2438_s25, %s2439_s26  }
  0x56   :  { %s2382_s1 = scalar_lea.hbm %s2832_s5, 2048 }
  0x57   :  { %p2383_p12 = scmp.ne.s32.totalorder %s2832_s5, %s2382_s1  ;;  %p2386_p13 = scmp.lt.u32.totalorder %s2382_s1, %s2832_s5 }
  0x59   :  { %p2388_p0 = pnand %p2386_p13, %p2383_p12 }
  0x5b   :  { %2391 = shalt.err (!%p2388_p0)
}
  0x5c   :  { %s2392_s20 = scalar_lea.vmem %s2574_s28, 2048  ;;  %p2397_p2 = scmp.lt.s32.totalorder %s2574_s28, %s2574_s28 }
  0x5d   :  { %p2393_p1 = scmp.ne.s32.totalorder %s2574_s28, %s2392_s20  ;;  %p2398_p3 = scmp.lt.s32.totalorder %s2392_s20, %s2392_s20 }
  0x5f   :  { %p2399_p4 = por %p2398_p3, %p2397_p2 }
  0x61   :  { %p2400_p5 = pnand %p2399_p4, %p2393_p1 }
  0x63   :  { %2403 = shalt.err (!%p2400_p5)
}
  0x64   :  { %91 = dma.hbm_to_vmem [thread:$0]  %s2832_s5, 2048, %s2574_s28, [#allocation12], %s2438_s25, %s2438_s25, %s2439_s26  }
  0x65   :  { %2426 = dma.done.wait [#allocation3], 512  }
  0x66   :  { %2427 = vsyncadd [#allocation3], 4294966784 }
  0x67   :  { %2428 = dma.done.wait [#allocation6], 1024  }
  0x68   :  { %2429 = vsyncadd [#allocation6], 4294966272 }
  0x69   :  { %2430 = dma.done.wait [#allocation9], 12288  }
  0x6a   :  { %2431 = vsyncadd [#allocation9], 4294955008 }
  0x6b   :  { %2432 = dma.done.wait [#allocation12], 2048  }
  0x6c   :  { %2433 = vsyncadd [#allocation12], 4294965248  ;;  %vm194_vm0 = vcmask 261120   ;;  %v2611_v0 = vld [vmem:[#allocation2] sm:$0xff]  ;;  %v2613_v1 = vld [vmem:[#allocation2 + $0x8] sm:$0xff]  ;;  %s2444_s11 = smov [#allocation13]  }
  0x6d   :  { %v2615_v2 = vld [vmem:[#allocation2 + $0x10] sm:$0xff]  ;;  %v1967_v3 = vpack.c.bf16 %v2613_v1, %v2611_v0  ;;  %v2619_v4 = vld [vmem:[#allocation2 + $0x18] sm:$0xff]  ;;  %v2621_v5 = vld [vmem:[#allocation5] sm:$0xff]  ;;  %s1412_s3 = sshll.u32 %s2444_s11, 4  ;;  %s1413_s3 = int_to_ptr.vmem [resolvable:$true] %s1412_s3 }
  0x6e   :  { %v1971_v6 = vpack.c.bf16 %v2619_v4, %v2615_v2  ;;  %1691 = vmatprep.mubr.msk.f32.mxu0 %vm194_vm0, %v2621_v5  ;;  %v2627_v7 = vld [vmem:[#allocation7] sm:$0xff]  ;;  %v163_v9 = vld [vmem:[#allocation8 + $0x88] sm:$0xff]  ;;  %v164_v16 = vld [vmem:[#allocation8 + $0x90] sm:$0xff]  ;;  %p2409_p7 = scmp.lt.s32.totalorder %s1413_s3, %s1413_s3 }
  0x6f   :  { %1968 = vmatprep.subr.bf16.mxu0 %v1967_v3  ;;  %1976 = vmatprep.subr.bf16.mxu1 %v1967_v3  ;;  %v162_v8 = vld [vmem:[#allocation8 + $0x80] sm:$0xff]  ;;  %v179_v12 = vld [vmem:[#allocation8 + $0x108] sm:$0xff]  ;;  %v165_v17 = vld [vmem:[#allocation8 + $0x98] sm:$0xff] }
  0x70   :  { %1970 = vmatpush3.bf16.msra.mxu0 %v1967_v3  ;;  %1978 = vmatpush3.bf16.msra.mxu1 %v1967_v3  ;;  %v1983_v10 = vpack.c.bf16 %v163_v9, %v162_v8  ;;  %v178_v11 = vld [vmem:[#allocation8 + $0x100] sm:$0xff]  ;;  %v147_v14 = vld [vmem:[#allocation8 + $0x8] sm:$0xff]  ;;  %v180_v18 = vld [vmem:[#allocation8 + $0x110] sm:$0xff]  ;;  %v1987_v25 = vpack.c.bf16 %v165_v17, %v164_v16 }
  0x71   :  { %1972 = vmatprep.subr.bf16.mxu0 %v1971_v6  ;;  %1980 = vmatprep.subr.bf16.mxu1 %v1971_v6  ;;  %v146_v13 = vld [vmem:[#allocation8] sm:$0xff]  ;;  %v2015_v15 = vpack.c.bf16 %v179_v12, %v178_v11  ;;  %v181_v19 = vld [vmem:[#allocation8 + $0x118] sm:$0xff]  ;;  %v2631_v20 = vld [vmem:[#allocation5 + $0x8] sm:$0xff] }
  0x72   :  { %1705 = vmatprep.mubr.msk.f32.mxu1 %vm194_vm0, %v2627_v7  ;;  %v2633_v21 = vld [vmem:[#allocation7 + $0x8] sm:$0xff]  ;;  %v2635_v22 = vld [vmem:[#allocation5 + $0x10] sm:$0xff]  ;;  %v1985_v24 = vpack.c.bf16 %v147_v14, %v146_v13  ;;  %v149_v27 = vld [vmem:[#allocation8 + $0x18] sm:$0xff]  ;;  %v2019_v28 = vpack.c.bf16 %v181_v19, %v180_v18 }
  0x73   :  { %v2637_v23 = vld [vmem:[#allocation7 + $0x10] sm:$0xff]  ;;  %v166_v29 = vld [vmem:[#allocation8 + $0xa0] sm:$0xff]  ;;  %v167_v30 = vld [vmem:[#allocation8 + $0xa8] sm:$0xff] }
  0x74   :  { %1974 = vmatpush3.bf16.msra.mxu0 %v1971_v6  ;;  %1982 = vmatpush3.bf16.msra.mxu1 %v1971_v6  ;;  %v148_v26 = vld [vmem:[#allocation8 + $0x10] sm:$0xff]  ;;  %v182_v31 = vld [vmem:[#allocation8 + $0x120] sm:$0xff]  ;;  %v183_v32 = vld [vmem:[#allocation8 + $0x128] sm:$0xff]  ;;  %v1991_v36 = vpack.c.bf16 %v167_v30, %v166_v29 }
  0x75   :  { %1984 = vmatprep.subr.bf16.mxu0 %v1983_v10  ;;  %2016 = vmatprep.subr.bf16.mxu1 %v2015_v15  ;;  %v2645_v33 = vld [vmem:[#allocation5 + $0x18] sm:$0xff]  ;;  %v1989_v35 = vpack.c.bf16 %v149_v27, %v148_v26  ;;  %v150_v37 = vld [vmem:[#allocation8 + $0x20] sm:$0xff]  ;;  %v151_v38 = vld [vmem:[#allocation8 + $0x28] sm:$0xff]  ;;  %v2023_v39 = vpack.c.bf16 %v183_v32, %v182_v31 }
  0x76   :  { %v2649_v34 = vld [vmem:[#allocation7 + $0x18] sm:$0xff]  ;;  %v168_v40 = vld [vmem:[#allocation8 + $0xb0] sm:$0xff]  ;;  %v1993_v44 = vpack.c.bf16 %v151_v38, %v150_v37  ;;  %v170_v49 = vld [vmem:[#allocation8 + $0xc0] sm:$0xff] }
  0x77   :  { %1692 = vmatmul.mubr.msk.f32.vlgmr.msra.gmra.mrb[0].mxu0 %vm194_vm0, %v2631_v20  ;;  %1706 = vmatmul.mubr.msk.f32.vlgmr.msra.gmra.mrb[0].mxu1 %vm194_vm0, %v2633_v21  ;;  %v169_v41 = vld [vmem:[#allocation8 + $0xb8] sm:$0xff]  ;;  %v184_v42 = vld [vmem:[#allocation8 + $0x130] sm:$0xff]  ;;  %v171_v50 = vld [vmem:[#allocation8 + $0xc8] sm:$0xff] }
  0x78   :  { %1694 = vmatprep.mubr.msk.f32.mxu0 %vm194_vm0, %v2635_v22  ;;  %1708 = vmatprep.mubr.msk.f32.mxu1 %vm194_vm0, %v2637_v23  ;;  %v185_v43 = vld [vmem:[#allocation8 + $0x138] sm:$0xff]  ;;  %v1995_v45 = vpack.c.bf16 %v169_v41, %v168_v40  ;;  %v152_v46 = vld [vmem:[#allocation8 + $0x30] sm:$0xff]  ;;  %v186_v51 = vld [vmem:[#allocation8 + $0x140] sm:$0xff]  ;;  %v1999_v54 = vpack.c.bf16 %v171_v50, %v170_v49 }
  0x79   :  { %1986 = vmatpush3.bf16.msra.mxu0 %v1985_v24  ;;  %2018 = vmatpush3.bf16.msra.mxu1 %v2015_v15  ;;  %v153_v47 = vld [vmem:[#allocation8 + $0x38] sm:$0xff]  ;;  %v2027_v48 = vpack.c.bf16 %v185_v43, %v184_v42  ;;  %v187_v52 = vld [vmem:[#allocation8 + $0x148] sm:$0xff]  ;;  %v154_v55 = vld [vmem:[#allocation8 + $0x40] sm:$0xff] }
  0x7a   :  { %1988 = vmatprep.subr.bf16.mxu0 %v1987_v25  ;;  %2020 = vmatprep.subr.bf16.mxu1 %v2019_v28  ;;  %v1997_v53 = vpack.c.bf16 %v153_v47, %v152_v46  ;;  %v155_v56 = vld [vmem:[#allocation8 + $0x48] sm:$0xff]  ;;  %v2031_v57 = vpack.c.bf16 %v187_v52, %v186_v51  ;;  %v172_v58 = vld [vmem:[#allocation8 + $0xd0] sm:$0xff]  ;;  %v173_v59 = vld [vmem:[#allocation8 + $0xd8] sm:$0xff] }
  0x7b   :  { %1695 = vmatmul.mubr.msk.f32.gmra.mrb[2].mxu0 %vm194_vm0, %v2645_v33  ;;  %1709 = vmatmul.mubr.msk.f32.gmra.mrb[2].mxu1 %vm194_vm0, %v2649_v34  ;;  %v188_v60 = vld [vmem:[#allocation8 + $0x150] sm:$0xff]  ;;  %v189_v61 = vld [vmem:[#allocation8 + $0x158] sm:$0xff]  ;;  %v2001_v62 = vpack.c.bf16 %v155_v56, %v154_v55  ;;  %v2003_v63 = vpack.c.bf16 %v173_v59, %v172_v58  ;;  %v174_v8 = vld [vmem:[#allocation8 + $0xe0] sm:$0xff] }
  0x7c   :  { %453 = vmatprep.mubr.f32.mxu0 %v2611_v0  ;;  %v156_v0 = vld [vmem:[#allocation8 + $0x50] sm:$0xff]  ;;  %v157_v3 = vld [vmem:[#allocation8 + $0x58] sm:$0xff]  ;;  %v2035_v6 = vpack.c.bf16 %v189_v61, %v188_v60  ;;  %v175_v9 = vld [vmem:[#allocation8 + $0xe8] sm:$0xff] }
  0x7d   :  { %1990 = vmatpush3.bf16.msra.mxu0 %v1989_v35  ;;  %2022 = vmatpush3.bf16.msra.mxu1 %v2019_v28  ;;  %v190_v10 = vld [vmem:[#allocation8 + $0x160] sm:$0xff]  ;;  %v191_v11 = vld [vmem:[#allocation8 + $0x168] sm:$0xff]  ;;  %v2005_v12 = vpack.c.bf16 %v157_v3, %v156_v0  ;;  %v2007_v13 = vpack.c.bf16 %v175_v9, %v174_v8  ;;  %v176_v17 = vld [vmem:[#allocation8 + $0xf0] sm:$0xff] }
  0x7e   :  { %1992 = vmatprep.subr.bf16.mxu0 %v1991_v36  ;;  %2024 = vmatprep.subr.bf16.mxu1 %v2023_v39  ;;  %v158_v14 = vld [vmem:[#allocation8 + $0x60] sm:$0xff]  ;;  %v159_v15 = vld [vmem:[#allocation8 + $0x68] sm:$0xff]  ;;  %v2039_v16 = vpack.c.bf16 %v191_v11, %v190_v10  ;;  %v177_v18 = vld [vmem:[#allocation8 + $0xf8] sm:$0xff] }
  0x7f   :  { %v2009_v19 = vpack.c.bf16 %v159_v15, %v158_v14  ;;  %v2011_v24 = vpack.c.bf16 %v177_v18, %v176_v17  ;;  %v160_v25 = vld [vmem:[#allocation8 + $0x70] sm:$0xff]  ;;  %v161_v26 = vld [vmem:[#allocation8 + $0x78] sm:$0xff]  ;;  %v130_v31 = vld [vmem:[#allocation11] sm:$0xff] }
  0x80   :  { %v2013_v27 = vpack.c.bf16 %v161_v26, %v160_v25  ;;  %v192_v28 = vld [vmem:[#allocation8 + $0x170] sm:$0xff]  ;;  %v193_v29 = vld [vmem:[#allocation8 + $0x178] sm:$0xff]  ;;  %v131_v32 = vld [vmem:[#allocation11 + $0x8] sm:$0xff] }
  0x81   :  { %1994 = vmatpush3.bf16.msra.mxu0 %v1993_v44  ;;  %2026 = vmatpush3.bf16.msra.mxu1 %v2023_v39  ;;  %v2043_v30 = vpack.c.bf16 %v193_v29, %v192_v28  ;;  %v2656_v35 = vpack.c.bf16 %v131_v32, %v130_v31  ;;  %v132_v36 = vld [vmem:[#allocation11 + $0x10] sm:$0xff]  ;;  %v133_v37 = vld [vmem:[#allocation11 + $0x18] sm:$0xff]  ;;  %v134_v43 = vld [vmem:[#allocation11 + $0x20] sm:$0xff] }
  0x82   :  { %1996 = vmatprep.subr.bf16.mxu0 %v1995_v45  ;;  %2028 = vmatprep.subr.bf16.mxu1 %v2027_v48  ;;  %v2660_v42 = vpack.c.bf16 %v133_v37, %v132_v36  ;;  %v135_v44 = vld [vmem:[#allocation11 + $0x28] sm:$0xff]  ;;  %v136_v50 = vld [vmem:[#allocation11 + $0x30] sm:$0xff]  ;;  %v137_v51 = vld [vmem:[#allocation11 + $0x38] sm:$0xff] }
  0x83   :  { %v2667_v49 = vpack.c.bf16 %v135_v44, %v134_v43  ;;  %v138_v52 = vld [vmem:[#allocation11 + $0x40] sm:$0xff]  ;;  %v141_v55 = vld [vmem:[#allocation11 + $0x58] sm:$0xff]  ;;  %v144_v59 = vld [vmem:[#allocation11 + $0x70] sm:$0xff] }
  0x84   :  { %v142_v56 = vld [vmem:[#allocation11 + $0x60] sm:$0xff]  ;;  %v145_v60 = vld [vmem:[#allocation11 + $0x78] sm:$0xff] }
  0x85   :  { %1998 = vmatpush3.bf16.msra.mxu0 %v1997_v53  ;;  %2030 = vmatpush3.bf16.msra.mxu1 %v2027_v48  ;;  %v139_v53 = vld [vmem:[#allocation11 + $0x48] sm:$0xff]  ;;  %v2701_v61 = vpack.c.bf16 %v145_v60, %v144_v59 }
  0x86   :  { %2000 = vmatprep.subr.bf16.mxu0 %v1999_v54  ;;  %2032 = vmatprep.subr.bf16.mxu1 %v2031_v57  ;;  %v140_v54 = vld [vmem:[#allocation11 + $0x50] sm:$0xff] }
  0x89   :  { %2002 = vmatpush3.bf16.msra.mxu0 %v2001_v62  ;;  %2034 = vmatpush3.bf16.msra.mxu1 %v2031_v57  ;;  %v143_v57 = vld [vmem:[#allocation11 + $0x68] sm:$0xff] }
  0x8a   :  { %2004 = vmatprep.subr.bf16.mxu0 %v2003_v63  ;;  %2036 = vmatprep.subr.bf16.mxu1 %v2035_v6  ;;  %v2695_v58 = vpack.c.bf16 %v143_v57, %v142_v56 }
  0x8d   :  { %2006 = vmatpush3.bf16.msra.mxu0 %v2005_v12  ;;  %2038 = vmatpush3.bf16.msra.mxu1 %v2035_v6 }
  0x8e   :  { %2008 = vmatprep.subr.bf16.mxu0 %v2007_v13  ;;  %2040 = vmatprep.subr.bf16.mxu1 %v2039_v16 }
  0x91   :  { %2010 = vmatpush3.bf16.msra.mxu0 %v2009_v19  ;;  %2042 = vmatpush3.bf16.msra.mxu1 %v2039_v16 }
  0x92   :  { %2012 = vmatprep.subr.bf16.mxu0 %v2011_v24  ;;  %2044 = vmatprep.subr.bf16.mxu1 %v2043_v30 }
  0x95   :  { %2014 = vmatpush3.bf16.msra.mxu0 %v2013_v27  ;;  %2046 = vmatpush3.bf16.msra.mxu1 %v2043_v30 }
  0x96   :  { %2048 = vmatprep.subr.bf16.mxu0 %v2656_v35  ;;  %2080 = vmatprep.subr.bf16.mxu1 %v2656_v35 }
 0x14a   :  { %v1693_v38 = vpop.f32.mrb[0].mxu0  ;;  %v1707_v39 = vpop.f32.mrb[0].mxu1 }
 0x14b   :  { %v273_v40 = vpop.f32.mrb[1].mxu0  ;;  %v370_v41 = vpop.f32.mrb[1].mxu1 }
 0x14c   :  { %454 = vmatmul.mubr.f32.vlgmr.msra.gmra.mrb[4].mxu0 %v273_v40  ;;  %1743 = vmatprep.mubr.f32.mxu1 %v370_v41 }
 0x14d   :  { %1744 = vmatmul.mubr.f32.vlgmr.msra.gmra.mrb[4].mxu1 %v1707_v39  ;;  %458 = vmatprep.mubr.f32.mxu0 %v2613_v1  ;;  %v2674_v1 = vpack.c.bf16 %v137_v51, %v136_v50 }
 0x14e   :  { %v1696_v45 = vpop.f32.mrb[2].mxu0  ;;  %v1710_v46 = vpop.f32.mrb[2].mxu1  ;;  %2050 = vmatpush3.bf16.msra.mxu0 %v2656_v35  ;;  %2082 = vmatpush3.bf16.msra.mxu1 %v2656_v35 }
 0x14f   :  { %v283_v47 = vpop.f32.mrb[3].mxu0  ;;  %v380_v48 = vpop.f32.mrb[3].mxu1  ;;  %2052 = vmatprep.subr.bf16.mxu0 %v2660_v42  ;;  %2084 = vmatprep.subr.bf16.mxu1 %v2660_v42 }
 0x150   :  { %459 = vmatmul.mubr.f32.gmra.mrb[6].mxu0 %v1693_v38  ;;  %1746 = vmatprep.mubr.f32.mxu1 %v380_v48 }
 0x151   :  { %463 = vmatprep.mubr.f32.mxu0 %v2615_v2  ;;  %1747 = vmatmul.mubr.f32.gmra.mrb[6].mxu1 %v1710_v46  ;;  %v2681_v2 = vpack.c.bf16 %v139_v53, %v138_v52 }
 0x152   :  { %2054 = vmatpush3.bf16.msra.mxu0 %v2660_v42  ;;  %2086 = vmatpush3.bf16.msra.mxu1 %v2660_v42 }
 0x153   :  { %2056 = vmatprep.subr.bf16.mxu0 %v2667_v49  ;;  %2088 = vmatprep.subr.bf16.mxu1 %v2667_v49 }
 0x154   :  { %464 = vmatmul.mubr.f32.gmra.mrb[8].mxu0 %v283_v47 }
 0x155   :  { %468 = vmatprep.mubr.f32.mxu0 %v2619_v4  ;;  %v2687_v4 = vpack.c.bf16 %v141_v55, %v140_v54 }
 0x156   :  { %2058 = vmatpush3.bf16.msra.mxu0 %v2667_v49  ;;  %2090 = vmatpush3.bf16.msra.mxu1 %v2667_v49 }
 0x157   :  { %2060 = vmatprep.subr.bf16.mxu0 %v2674_v1  ;;  %2092 = vmatprep.subr.bf16.mxu1 %v2674_v1 }
 0x158   :  { %469 = vmatmul.mubr.f32.gmra.mrb[10].mxu0 %v1696_v45 }
 0x15a   :  { %2062 = vmatpush3.bf16.msra.mxu0 %v2674_v1  ;;  %2094 = vmatpush3.bf16.msra.mxu1 %v2674_v1 }
 0x15b   :  { %2064 = vmatprep.subr.bf16.mxu0 %v2681_v2  ;;  %2096 = vmatprep.subr.bf16.mxu1 %v2681_v2 }
 0x15e   :  { %2066 = vmatpush3.bf16.msra.mxu0 %v2681_v2  ;;  %2098 = vmatpush3.bf16.msra.mxu1 %v2681_v2 }
 0x15f   :  { %2068 = vmatprep.subr.bf16.mxu0 %v2687_v4  ;;  %2100 = vmatprep.subr.bf16.mxu1 %v2687_v4 }
 0x162   :  { %2070 = vmatpush3.bf16.msra.mxu0 %v2687_v4  ;;  %2102 = vmatpush3.bf16.msra.mxu1 %v2687_v4 }
 0x163   :  { %2072 = vmatprep.subr.bf16.mxu0 %v2695_v58  ;;  %2104 = vmatprep.subr.bf16.mxu1 %v2695_v58 }
 0x166   :  { %2074 = vmatpush3.bf16.msra.mxu0 %v2695_v58  ;;  %2106 = vmatpush3.bf16.msra.mxu1 %v2695_v58 }
 0x167   :  { %2076 = vmatprep.subr.bf16.mxu0 %v2701_v61  ;;  %2108 = vmatprep.subr.bf16.mxu1 %v2701_v61 }
 0x16a   :  { %2078 = vmatpush3.bf16.msra.mxu0 %v2701_v61  ;;  %2110 = vmatpush3.bf16.msra.mxu1 %v2701_v61 }
 0x21f   :  { %v1491_v62 = vpop.f32.mrb[4].mxu0 }
 0x220   :  { %v1492_v63 = vpop.f32.mrb[5].mxu0  ;;  %v1745_v0 = vpop.f32.mrb[4].mxu1 }
 0x221   :  { %v1493_v3 = vadd.f32 %v1492_v63, %v1491_v62  ;;  %v540_v6 = vpop.f32.mrb[5].mxu1 }
 0x223   :  { %v2707_v8 = vadd.f32 %v1493_v3, %v540_v6  ;;  %v1494_v9 = vpop.f32.mrb[6].mxu0 }
 0x224   :  { %v1495_v10 = vpop.f32.mrb[7].mxu0  ;;  %v1748_v11 = vpop.f32.mrb[6].mxu1 }
 0x225   :  { %v1496_v12 = vadd.f32 %v1495_v10, %v1494_v9  ;;  %1781 = vmatprep.mubr.f32.mxu0 %v2707_v8  ;;  %v655_v13 = vmul.f32 %v2707_v8, %v2707_v8  ;;  %v550_v14 = vpop.f32.mrb[7].mxu1  ;;  %v764_v10 = vlaneseq }
 0x227   :  { %v2712_v15 = vadd.f32 %v1745_v0, %v1496_v12  ;;  %v1497_v16 = vpop.f32.mrb[8].mxu0  ;;  %1819 = vmatprep.mubr.f32.mxu1 %v655_v13  ;;  %v559_v12 = vld [vmem:[%s2833_s6] sm:$0x1] }
 0x228   :  { %v1498_v17 = vpop.f32.mrb[9].mxu0 }
 0x229   :  { %v656_v18 = vmul.f32 %v2712_v15, %v2712_v15  ;;  %v1499_v19 = vadd.f32 %v1498_v17, %v1497_v16  ;;  %1782 = vmatmul.mubr.f32.vlgmr.msra.gmra.mrb[12].mxu0 %v2712_v15  ;;  %v560_v17 = vld [vmem:[%s2834_s7] sm:$0x1] }
 0x22b   :  { %v551_v24 = vadd.f32 %v1499_v19, %v550_v14  ;;  %v1500_v25 = vpop.f32.mrb[10].mxu0  ;;  %1820 = vmatmul.mubr.f32.vlgmr.msra.gmra.mrb[8].mxu1 %v656_v18 }
 0x22c   :  { %v1501_v26 = vpop.f32.mrb[11].mxu0 }
 0x22d   :  { %v1502_v27 = vadd.f32 %v1501_v26, %v1500_v25  ;;  %1784 = vmatprep.mubr.f32.mxu0 %v551_v24  ;;  %v657_v28 = vmul.f32 %v551_v24, %v551_v24 }
 0x22f   :  { %v556_v29 = vadd.f32 %v1748_v11, %v1502_v27  ;;  %1822 = vmatprep.mubr.f32.mxu1 %v657_v28  ;;  %v765_v11 = vshrl.u32 %v764_v10, 7  ;;  %v809_v10 = vld [vmem:[#allocation10 + $0xb0] sm:$0xff] }
 0x231   :  { %1785 = vmatmul.mubr.f32.gmra.mrb[14].mxu0 %v556_v29  ;;  %v658_v30 = vmul.f32 %v556_v29, %v556_v29  ;;  %v2724_v13 = vsub.s32 0, %v765_v11  ;;  %v826_v11 = vld [vmem:[#allocation10 + $0x138] sm:$0xff] }
 0x232   :  { %1833 = vmatprep.mubr.msk.f32.mxu0 %vm194_vm0, %v2621_v5 }
 0x233   :  { %1823 = vmatmul.mubr.f32.gmra.mrb[10].mxu1 %v658_v30 }
 0x234   :  { %1847 = vmatprep.mubr.msk.f32.mxu1 %vm194_vm0, %v2627_v7 }
 0x2fc   :  { %v1783_v31 = vpop.f32.mrb[12].mxu0 }
 0x2fd   :  { %v627_v32 = vpop.f32.mrb[13].mxu0 }
 0x2fe   :  { %v646_v36 = vadd.f32 %v1783_v31, %v627_v32  ;;  %v1821_v37 = vpop.f32.mrb[8].mxu1 }
 0x2ff   :  { %v725_v38 = vpop.f32.mrb[9].mxu1 }
 0x300   :  { %v744_v39 = vadd.f32 %v1821_v37, %v725_v38 }
 0x304   :  { %v1786_v40 = vpop.f32.mrb[14].mxu0 }
 0x305   :  { %v637_v41 = vpop.f32.mrb[15].mxu0 }
 0x306   :  { %v647_v43 = vadd.f32 %v646_v36, %v637_v41  ;;  %v1824_v44 = vpop.f32.mrb[10].mxu1 }
 0x307   :  { %v735_v45 = vpop.f32.mrb[11].mxu1 }
 0x308   :  { %v648_v46 = vadd.f32 %v1786_v40, %v647_v43  ;;  %v745_v47 = vadd.f32 %v744_v39, %v735_v45  ;;  %v803_v43 = vld [vmem:[#allocation10 + $0x80] sm:$0xff] }
 0x30a   :  { %v649_v48 = vrot.slane %v648_v46, 4  ;;  %v746_v50 = vadd.f32 %v1824_v44, %v745_v47  ;;  %v820_v44 = vld [vmem:[#allocation10 + $0x108] sm:$0xff] }
 0x30c   :  { %v650_v5 = vadd.f32 %v649_v48, %v648_v46  ;;  %v747_v51 = vrot.slane %v746_v50, 4  ;;  %v787_v48 = vld [vmem:[#allocation10] sm:$0xff] }
 0x30e   :  { %v651_v52 = vrot.slane %v650_v5, 2  ;;  %v748_v53 = vadd.f32 %v747_v51, %v746_v50  ;;  %v788_v50 = vld [vmem:[#allocation10 + $0x8] sm:$0xff]  ;;  %v806_v51 = vld [vmem:[#allocation10 + $0x98] sm:$0xff] }
 0x310   :  { %v652_v7 = vadd.f32 %v651_v52, %v650_v5  ;;  %v749_v54 = vrot.slane %v748_v53, 2  ;;  %v805_v5 = vld [vmem:[#allocation10 + $0x90] sm:$0xff] }
 0x311   :  { %v821_v52 = vld [vmem:[#allocation10 + $0x110] sm:$0xff] }
 0x312   :  { %v653_v55 = vrot.slane %v652_v7, 1  ;;  %v750_v56 = vadd.f32 %v749_v54, %v748_v53  ;;  %v822_v53 = vld [vmem:[#allocation10 + $0x118] sm:$0xff]  ;;  %v2131_v54 = vpack.c.bf16 %v806_v51, %v805_v5 }
 0x314   :  { %v654_v57 = vadd.f32 %v653_v55, %v652_v7  ;;  %v751_v59 = vrot.slane %v750_v56, 1  ;;  %v2129_v7 = vpack.c.bf16 %v788_v50, %v787_v48  ;;  %v789_v55 = vld [vmem:[#allocation10 + $0x10] sm:$0xff]  ;;  %v831_v48 = vld [vmem:[#allocation10 + $0x160] sm:$0xff]  ;;  %v832_v50 = vld [vmem:[#allocation10 + $0x168] sm:$0xff] }
 0x316   :  { %v753_v60 = vmul.f32 0.001953125, %v654_v57  ;;  %v752_v62 = vadd.f32 %v751_v59, %v750_v56  ;;  %v790_v56 = vld [vmem:[#allocation10 + $0x18] sm:$0xff]  ;;  %v2163_v57 = vpack.c.bf16 %v822_v53, %v821_v52  ;;  %v807_v59 = vld [vmem:[#allocation10 + $0xa0] sm:$0xff]  ;;  %v800_v53 = vld [vmem:[#allocation10 + $0x68] sm:$0xff] }
 0x317   :  { %v799_v52 = vld [vmem:[#allocation10 + $0x60] sm:$0xff] }
 0x318   :  { %v755_v63 = vmul.f32 %v753_v60, %v753_v60  ;;  %v754_v0 = vmul.f32 0.001953125, %v752_v62  ;;  %v823_v62 = vld [vmem:[#allocation10 + $0x120] sm:$0xff] }
 0x31a   :  { %v756_v3 = vsub.f32 %v754_v0, %v755_v63  ;;  %v824_v63 = vld [vmem:[#allocation10 + $0x128] sm:$0xff]  ;;  %v2133_v0 = vpack.c.bf16 %v790_v56, %v789_v55  ;;  %v818_v55 = vld [vmem:[#allocation10 + $0xf8] sm:$0xff]  ;;  %v2153_v56 = vpack.c.bf16 %v800_v53, %v799_v52 }
 0x31c   :  { %v757_v6 = vmax.f32 %v756_v3, 0.0 }
 0x31e   :  { %v758_v9 = vadd.f32 1e-05, %v757_v6  ;;  %v791_v6 = vld [vmem:[#allocation10 + $0x20] sm:$0xff] }
 0x320   :  { %2264 = vrsqrt.f32 %v758_v9  ;;  %v2167_v9 = vpack.c.bf16 %v824_v63, %v823_v62  ;;  %v833_v63 = vld [vmem:[#allocation10 + $0x170] sm:$0xff] }
 0x32a   :  { %v2265_v14 = vpop.eup %2264 }
 0x32b   :  { %v760_v16 = vmul.f32 %v2265_v14, %v559_v12  ;;  %v793_v14 = vld [vmem:[#allocation10 + $0x30] sm:$0xff] }
 0x32d   :  { %v761_v18 = vmul.f32 %v760_v16, %v753_v60  ;;  %v767_v19 = vrot.slane %v760_v16, %v2724_v13  ;;  %v808_v60 = vld [vmem:[#allocation10 + $0xa8] sm:$0xff]  ;;  %v794_v16 = vld [vmem:[#allocation10 + $0x38] sm:$0xff] }
 0x32e   :  { %v2135_v3 = vpack.c.bf16 %v808_v60, %v807_v59  ;;  %v801_v59 = vld [vmem:[#allocation10 + $0x70] sm:$0xff]  ;;  %v802_v60 = vld [vmem:[#allocation10 + $0x78] sm:$0xff] }
 0x32f   :  { %v762_v25 = vsub.f32 %v560_v17, %v761_v18  ;;  %v769_v26 = vmul.f32 %v767_v19, %v2707_v8  ;;  %v770_v27 = vmul.f32 %v767_v19, %v2712_v15  ;;  %v771_v30 = vmul.f32 %v767_v19, %v551_v24  ;;  %v804_v24 = vld [vmem:[#allocation10 + $0x88] sm:$0xff]  ;;  %v811_v18 = vld [vmem:[#allocation10 + $0xc0] sm:$0xff] }
 0x330   :  { %v772_v31 = vmul.f32 %v767_v19, %v556_v29  ;;  %v819_v29 = vld [vmem:[#allocation10 + $0x100] sm:$0xff]  ;;  %v2127_v46 = vpack.c.bf16 %v804_v24, %v803_v43  ;;  %v812_v19 = vld [vmem:[#allocation10 + $0xc8] sm:$0xff]  ;;  %v2157_v62 = vpack.c.bf16 %v802_v60, %v801_v59 }
 0x331   :  { %v777_v28 = vrot.slane %v762_v25, %v2724_v13  ;;  %v2159_v47 = vpack.c.bf16 %v820_v44, %v819_v29  ;;  %v827_v25 = vld [vmem:[#allocation10 + $0x140] sm:$0xff]  ;;  %v797_v29 = vld [vmem:[#allocation10 + $0x50] sm:$0xff]  ;;  %v798_v44 = vld [vmem:[#allocation10 + $0x58] sm:$0xff] }
 0x332   :  { %v2149_v5 = vpack.c.bf16 %v798_v44, %v797_v29 }
 0x333   :  { %v779_v32 = vadd.f32 %v777_v28, %v769_v26  ;;  %v2733_v36 = vadd.f32 %v777_v28, %v770_v27  ;;  %v2735_v37 = vadd.f32 %v777_v28, %v771_v30  ;;  %v2737_v38 = vadd.f32 %v777_v28, %v772_v31  ;;  %v795_v27 = vld [vmem:[#allocation10 + $0x40] sm:$0xff]  ;;  %v796_v28 = vld [vmem:[#allocation10 + $0x48] sm:$0xff]  ;;  %v813_v31 = vld [vmem:[#allocation10 + $0xd0] sm:$0xff] }
 0x334   :  { %v2143_v26 = vpack.c.bf16 %v812_v19, %v811_v18  ;;  %v2145_v43 = vpack.c.bf16 %v796_v28, %v795_v27 }
 0x335   :  { %v783_v39 = vmax.f32 %v779_v32, 0.0  ;;  %v784_v40 = vmax.f32 %v2733_v36, 0.0  ;;  %v785_v41 = vmax.f32 %v2735_v37, 0.0  ;;  %v786_v8 = vmax.f32 %v2737_v38, 0.0  ;;  %v814_v32 = vld [vmem:[#allocation10 + $0xd8] sm:$0xff] }
 0x336   :  { %v2147_v24 = vpack.c.bf16 %v814_v32, %v813_v31 }
 0x337   :  { %v2111_v15 = vpack.c.bf16 %v784_v40, %v783_v39  ;;  %v2115_v45 = vpack.c.bf16 %v786_v8, %v785_v41 }
 0x339   :  { %2112 = vmatprep.subr.bf16.mxu0 %v2111_v15  ;;  %2120 = vmatprep.subr.bf16.mxu1 %v2111_v15 }
 0x33a   :  { %2114 = vmatpush3.bf16.msra.mxu0 %v2111_v15  ;;  %2122 = vmatpush3.bf16.msra.mxu1 %v2111_v15  ;;  %v830_v15 = vld [vmem:[#allocation10 + $0x158] sm:$0xff] }
 0x33b   :  { %2116 = vmatprep.subr.bf16.mxu0 %v2115_v45  ;;  %2124 = vmatprep.subr.bf16.mxu1 %v2115_v45 }
 0x33e   :  { %2118 = vmatpush3.bf16.msra.mxu0 %v2115_v45  ;;  %2126 = vmatpush3.bf16.msra.mxu1 %v2115_v45 }
 0x33f   :  { %2128 = vmatprep.subr.bf16.mxu0 %v2127_v46  ;;  %2160 = vmatprep.subr.bf16.mxu1 %v2159_v47  ;;  %v815_v46 = vld [vmem:[#allocation10 + $0xe0] sm:$0xff] }
 0x341   :  { %1834 = vmatmul.mubr.msk.f32.vlgmr.msra.gmra.mrb[16].mxu0 %vm194_vm0, %v2631_v20  ;;  %1848 = vmatmul.mubr.msk.f32.vlgmr.msra.gmra.mrb[12].mxu1 %vm194_vm0, %v2633_v21  ;;  %v792_v20 = vld [vmem:[#allocation10 + $0x28] sm:$0xff]  ;;  %v810_v21 = vld [vmem:[#allocation10 + $0xb8] sm:$0xff] }
 0x342   :  { %1836 = vmatprep.mubr.msk.f32.mxu0 %vm194_vm0, %v2635_v22  ;;  %1850 = vmatprep.mubr.msk.f32.mxu1 %vm194_vm0, %v2637_v23  ;;  %v825_v22 = vld [vmem:[#allocation10 + $0x130] sm:$0xff]  ;;  %v2137_v23 = vpack.c.bf16 %v792_v20, %v791_v6  ;;  %v2139_v12 = vpack.c.bf16 %v810_v21, %v809_v10 }
 0x343   :  { %2130 = vmatpush3.bf16.msra.mxu0 %v2129_v7  ;;  %2162 = vmatpush3.bf16.msra.mxu1 %v2159_v47  ;;  %v2171_v17 = vpack.c.bf16 %v826_v11, %v825_v22  ;;  %v816_v47 = vld [vmem:[#allocation10 + $0xe8] sm:$0xff]  ;;  %v2183_v7 = vpack.c.bf16 %v832_v50, %v831_v48 }
 0x344   :  { %2132 = vmatprep.subr.bf16.mxu0 %v2131_v54  ;;  %2164 = vmatprep.subr.bf16.mxu1 %v2163_v57  ;;  %v2151_v51 = vpack.c.bf16 %v816_v47, %v815_v46  ;;  %v817_v54 = vld [vmem:[#allocation10 + $0xf0] sm:$0xff] }
 0x345   :  { %1837 = vmatmul.mubr.msk.f32.gmra.mrb[18].mxu0 %vm194_vm0, %v2645_v33  ;;  %1851 = vmatmul.mubr.msk.f32.gmra.mrb[14].mxu1 %vm194_vm0, %v2649_v34  ;;  %v828_v33 = vld [vmem:[#allocation10 + $0x148] sm:$0xff]  ;;  %v2141_v34 = vpack.c.bf16 %v794_v16, %v793_v14 }
 0x346   :  { %1069 = vmatprep.mubr.f32.mxu0 %v783_v39  ;;  %v2175_v30 = vpack.c.bf16 %v828_v33, %v827_v25  ;;  %v829_v39 = vld [vmem:[#allocation10 + $0x150] sm:$0xff] }
 0x347   :  { %2134 = vmatpush3.bf16.msra.mxu0 %v2133_v0  ;;  %2166 = vmatpush3.bf16.msra.mxu1 %v2163_v57  ;;  %v2179_v45 = vpack.c.bf16 %v830_v15, %v829_v39  ;;  %v2155_v57 = vpack.c.bf16 %v818_v55, %v817_v54  ;;  %v834_v0 = vld [vmem:[#allocation10 + $0x178] sm:$0xff] }
 0x348   :  { %2136 = vmatprep.subr.bf16.mxu0 %v2135_v3  ;;  %2168 = vmatprep.subr.bf16.mxu1 %v2167_v9  ;;  %v2187_v3 = vpack.c.bf16 %v834_v0, %v833_v63 }
 0x34b   :  { %2138 = vmatpush3.bf16.msra.mxu0 %v2137_v23  ;;  %2170 = vmatpush3.bf16.msra.mxu1 %v2167_v9 }
 0x34c   :  { %2140 = vmatprep.subr.bf16.mxu0 %v2139_v12  ;;  %2172 = vmatprep.subr.bf16.mxu1 %v2171_v17 }
 0x34f   :  { %2142 = vmatpush3.bf16.msra.mxu0 %v2141_v34  ;;  %2174 = vmatpush3.bf16.msra.mxu1 %v2171_v17 }
 0x350   :  { %2144 = vmatprep.subr.bf16.mxu0 %v2143_v26  ;;  %2176 = vmatprep.subr.bf16.mxu1 %v2175_v30 }
 0x353   :  { %2146 = vmatpush3.bf16.msra.mxu0 %v2145_v43  ;;  %2178 = vmatpush3.bf16.msra.mxu1 %v2175_v30 }
 0x354   :  { %2148 = vmatprep.subr.bf16.mxu0 %v2147_v24  ;;  %2180 = vmatprep.subr.bf16.mxu1 %v2179_v45 }
 0x357   :  { %2150 = vmatpush3.bf16.msra.mxu0 %v2149_v5  ;;  %2182 = vmatpush3.bf16.msra.mxu1 %v2179_v45 }
 0x358   :  { %2152 = vmatprep.subr.bf16.mxu0 %v2151_v51  ;;  %2184 = vmatprep.subr.bf16.mxu1 %v2183_v7 }
 0x35b   :  { %2154 = vmatpush3.bf16.msra.mxu0 %v2153_v56  ;;  %2186 = vmatpush3.bf16.msra.mxu1 %v2183_v7 }
 0x35c   :  { %2156 = vmatprep.subr.bf16.mxu0 %v2155_v57  ;;  %2188 = vmatprep.subr.bf16.mxu1 %v2187_v3 }
 0x35f   :  { %2158 = vmatpush3.bf16.msra.mxu0 %v2157_v62  ;;  %2190 = vmatpush3.bf16.msra.mxu1 %v2187_v3 }
 0x360   :  { %2192 = vmatprep.subr.bf16.mxu0 %v2656_v35  ;;  %2224 = vmatprep.subr.bf16.mxu1 %v2656_v35 }
 0x414   :  { %v1835_v6 = vpop.f32.mrb[16].mxu0  ;;  %v1849_v20 = vpop.f32.mrb[12].mxu1 }
 0x415   :  { %v901_v9 = vpop.f32.mrb[17].mxu0  ;;  %v986_v10 = vpop.f32.mrb[13].mxu1 }
 0x416   :  { %1070 = vmatmul.mubr.f32.vlgmr.msra.gmra.mrb[20].mxu0 %v901_v9  ;;  %1885 = vmatprep.mubr.f32.mxu1 %v986_v10 }
 0x417   :  { %1074 = vmatprep.mubr.f32.mxu0 %v784_v40  ;;  %1886 = vmatmul.mubr.f32.vlgmr.msra.gmra.mrb[16].mxu1 %v1849_v20  ;;  %v1175_v20 = vld [vmem:[%s2835_s8] sm:$0x1]  ;;  %s2404_s8 = scalar_lea.vmem %s1413_s3, 512 }
 0x418   :  { %v1838_v21 = vpop.f32.mrb[18].mxu0  ;;  %v1852_v22 = vpop.f32.mrb[14].mxu1  ;;  %2194 = vmatpush3.bf16.msra.mxu0 %v2656_v35  ;;  %2226 = vmatpush3.bf16.msra.mxu1 %v2656_v35  ;;  %p2405_p6 = scmp.ne.s32.totalorder %s1413_s3, %s2404_s8  ;;  %p2410_p8 = scmp.lt.s32.totalorder %s2404_s8, %s2404_s8 }
 0x419   :  { %v911_v11 = vpop.f32.mrb[19].mxu0  ;;  %v996_v23 = vpop.f32.mrb[15].mxu1  ;;  %2196 = vmatprep.subr.bf16.mxu0 %v2660_v42  ;;  %2228 = vmatprep.subr.bf16.mxu1 %v2660_v42 }
 0x41a   :  { %1075 = vmatmul.mubr.f32.gmra.mrb[22].mxu0 %v1835_v6  ;;  %1888 = vmatprep.mubr.f32.mxu1 %v996_v23  ;;  %p2411_p9 = por %p2410_p8, %p2409_p7 }
 0x41b   :  { %1079 = vmatprep.mubr.f32.mxu0 %v785_v41  ;;  %1889 = vmatmul.mubr.f32.gmra.mrb[18].mxu1 %v1852_v22 }
 0x41c   :  { %2198 = vmatpush3.bf16.msra.mxu0 %v2660_v42  ;;  %2230 = vmatpush3.bf16.msra.mxu1 %v2660_v42  ;;  %p2412_p10 = pnand %p2411_p9, %p2405_p6 }
 0x41d   :  { %2200 = vmatprep.subr.bf16.mxu0 %v2667_v49  ;;  %2232 = vmatprep.subr.bf16.mxu1 %v2667_v49 }
 0x41e   :  { %1080 = vmatmul.mubr.f32.gmra.mrb[24].mxu0 %v911_v11 }
 0x41f   :  { %1084 = vmatprep.mubr.f32.mxu0 %v786_v8 }
 0x420   :  { %2202 = vmatpush3.bf16.msra.mxu0 %v2667_v49  ;;  %2234 = vmatpush3.bf16.msra.mxu1 %v2667_v49 }
 0x421   :  { %2204 = vmatprep.subr.bf16.mxu0 %v2674_v1  ;;  %2236 = vmatprep.subr.bf16.mxu1 %v2674_v1 }
 0x422   :  { %1085 = vmatmul.mubr.f32.gmra.mrb[26].mxu0 %v1838_v21  ;;  %v1176_v21 = vld [vmem:[%s2836_s9] sm:$0x1] }
 0x424   :  { %2206 = vmatpush3.bf16.msra.mxu0 %v2674_v1  ;;  %2238 = vmatpush3.bf16.msra.mxu1 %v2674_v1 }
 0x425   :  { %2208 = vmatprep.subr.bf16.mxu0 %v2681_v2  ;;  %2240 = vmatprep.subr.bf16.mxu1 %v2681_v2 }
 0x428   :  { %2210 = vmatpush3.bf16.msra.mxu0 %v2681_v2  ;;  %2242 = vmatpush3.bf16.msra.mxu1 %v2681_v2 }
 0x429   :  { %2212 = vmatprep.subr.bf16.mxu0 %v2687_v4  ;;  %2244 = vmatprep.subr.bf16.mxu1 %v2687_v4 }
 0x42c   :  { %2214 = vmatpush3.bf16.msra.mxu0 %v2687_v4  ;;  %2246 = vmatpush3.bf16.msra.mxu1 %v2687_v4 }
 0x42d   :  { %2216 = vmatprep.subr.bf16.mxu0 %v2695_v58  ;;  %2248 = vmatprep.subr.bf16.mxu1 %v2695_v58 }
 0x430   :  { %2218 = vmatpush3.bf16.msra.mxu0 %v2695_v58  ;;  %2250 = vmatpush3.bf16.msra.mxu1 %v2695_v58 }
 0x431   :  { %2220 = vmatprep.subr.bf16.mxu0 %v2701_v61  ;;  %2252 = vmatprep.subr.bf16.mxu1 %v2701_v61 }
 0x434   :  { %2222 = vmatpush3.bf16.msra.mxu0 %v2701_v61  ;;  %2254 = vmatpush3.bf16.msra.mxu1 %v2701_v61 }
 0x4e9   :  { %v1611_v35 = vpop.f32.mrb[20].mxu0 }
 0x4ea   :  { %v1612_v42 = vpop.f32.mrb[21].mxu0  ;;  %v1887_v49 = vpop.f32.mrb[16].mxu1 }
 0x4eb   :  { %v1613_v1 = vadd.f32 %v1612_v42, %v1611_v35  ;;  %v1156_v2 = vpop.f32.mrb[17].mxu1 }
 0x4ed   :  { %v2798_v4 = vadd.f32 %v1613_v1, %v1156_v2  ;;  %v1614_v36 = vpop.f32.mrb[22].mxu0 }
 0x4ee   :  { %v1615_v37 = vpop.f32.mrb[23].mxu0  ;;  %v1890_v38 = vpop.f32.mrb[18].mxu1 }
 0x4ef   :  { %v1616_v40 = vadd.f32 %v1615_v37, %v1614_v36  ;;  %1923 = vmatprep.mubr.f32.mxu0 %v2798_v4  ;;  %v1271_v58 = vmul.f32 %v2798_v4, %v2798_v4  ;;  %v1166_v41 = vpop.f32.mrb[19].mxu1 }
 0x4f1   :  { %v1162_v8 = vadd.f32 %v1887_v49, %v1616_v40  ;;  %v1617_v12 = vpop.f32.mrb[24].mxu0  ;;  %1961 = vmatprep.mubr.f32.mxu1 %v1271_v58  ;;  %v2268_v58 = vld [vmem:[#allocation2] sm:$0xff] }
 0x4f2   :  { %v1618_v61 = vpop.f32.mrb[25].mxu0 }
 0x4f3   :  { %v1272_v14 = vmul.f32 %v1162_v8, %v1162_v8  ;;  %v1619_v16 = vadd.f32 %v1618_v61, %v1617_v12  ;;  %1924 = vmatmul.mubr.f32.vlgmr.msra.gmra.mrb[28].mxu0 %v1162_v8  ;;  %v2269_v12 = vld [vmem:[#allocation2 + $0x8] sm:$0xff] }
 0x4f5   :  { %v1167_v17 = vadd.f32 %v1619_v16, %v1166_v41  ;;  %v1620_v18 = vpop.f32.mrb[26].mxu0  ;;  %1962 = vmatmul.mubr.f32.vlgmr.msra.gmra.mrb[20].mxu1 %v1272_v14  ;;  %v2270_v14 = vld [vmem:[#allocation2 + $0x10] sm:$0xff] }
 0x4f6   :  { %v1621_v19 = vpop.f32.mrb[27].mxu0 }
 0x4f7   :  { %v1622_v25 = vadd.f32 %v1621_v19, %v1620_v18  ;;  %1926 = vmatprep.mubr.f32.mxu0 %v1167_v17  ;;  %v1273_v33 = vmul.f32 %v1167_v17, %v1167_v17  ;;  %v2271_v18 = vld [vmem:[#allocation2 + $0x18] sm:$0xff] }
 0x4f9   :  { %v1172_v34 = vadd.f32 %v1890_v38, %v1622_v25  ;;  %1964 = vmatprep.mubr.f32.mxu1 %v1273_v33 }
 0x4fb   :  { %1927 = vmatmul.mubr.f32.gmra.mrb[30].mxu0 %v1172_v34  ;;  %v1274_v26 = vmul.f32 %v1172_v34, %v1172_v34 }
 0x4fd   :  { %1965 = vmatmul.mubr.f32.gmra.mrb[22].mxu1 %v1274_v26 }
 0x5c6   :  { %v1925_v27 = vpop.f32.mrb[28].mxu0 }
 0x5c7   :  { %v1243_v28 = vpop.f32.mrb[29].mxu0 }
 0x5c8   :  { %v1262_v30 = vadd.f32 %v1925_v27, %v1243_v28  ;;  %v1963_v31 = vpop.f32.mrb[20].mxu1 }
 0x5c9   :  { %v1341_v32 = vpop.f32.mrb[21].mxu1 }
 0x5ca   :  { %v1360_v39 = vadd.f32 %v1963_v31, %v1341_v32 }
 0x5ce   :  { %v1928_v15 = vpop.f32.mrb[30].mxu0 }
 0x5cf   :  { %v1253_v43 = vpop.f32.mrb[31].mxu0 }
 0x5d0   :  { %v1263_v24 = vadd.f32 %v1262_v30, %v1253_v43  ;;  %v1966_v29 = vpop.f32.mrb[22].mxu1 }
 0x5d1   :  { %v1351_v44 = vpop.f32.mrb[23].mxu1 }
 0x5d2   :  { %v1264_v45 = vadd.f32 %v1928_v15, %v1263_v24  ;;  %v1361_v46 = vadd.f32 %v1360_v39, %v1351_v44 }
 0x5d4   :  { %v1265_v47 = vrot.slane %v1264_v45, 4  ;;  %v1362_v48 = vadd.f32 %v1966_v29, %v1361_v46 }
 0x5d6   :  { %v1266_v50 = vadd.f32 %v1265_v47, %v1264_v45  ;;  %v1363_v5 = vrot.slane %v1362_v48, 4 }
 0x5d8   :  { %v1267_v51 = vrot.slane %v1266_v50, 2  ;;  %v1364_v52 = vadd.f32 %v1363_v5, %v1362_v48 }
 0x5da   :  { %v1268_v53 = vadd.f32 %v1267_v51, %v1266_v50  ;;  %v1365_v7 = vrot.slane %v1364_v52, 2 }
 0x5dc   :  { %v1269_v54 = vrot.slane %v1268_v53, 1  ;;  %v1366_v55 = vadd.f32 %v1365_v7, %v1364_v52 }
 0x5de   :  { %v1270_v56 = vadd.f32 %v1269_v54, %v1268_v53  ;;  %v1367_v57 = vrot.slane %v1366_v55, 1 }
 0x5e0   :  { %v1369_v59 = vmul.f32 0.001953125, %v1270_v56  ;;  %v1368_v60 = vadd.f32 %v1367_v57, %v1366_v55 }
 0x5e2   :  { %v1371_v62 = vmul.f32 %v1369_v59, %v1369_v59  ;;  %v1370_v63 = vmul.f32 0.001953125, %v1368_v60 }
 0x5e4   :  { %v1372_v0 = vsub.f32 %v1370_v63, %v1371_v62 }
 0x5e6   :  { %v1373_v3 = vmax.f32 %v1372_v0, 0.0 }
 0x5e8   :  { %v1374_v6 = vadd.f32 1e-05, %v1373_v3 }
 0x5ea   :  { %2266 = vrsqrt.f32 %v1374_v6 }
 0x5f4   :  { %v2267_v9 = vpop.eup %2266 }
 0x5f5   :  { %v1376_v10 = vmul.f32 %v2267_v9, %v1175_v20 }
 0x5f7   :  { %v1377_v22 = vmul.f32 %v1376_v10, %v1369_v59  ;;  %v1383_v11 = vrot.slane %v1376_v10, %v2724_v13 }
 0x5f9   :  { %v1378_v23 = vsub.f32 %v1176_v21, %v1377_v22  ;;  %v1385_v35 = vmul.f32 %v1383_v11, %v2798_v4  ;;  %v1386_v42 = vmul.f32 %v1383_v11, %v1162_v8  ;;  %v1387_v49 = vmul.f32 %v1383_v11, %v1167_v17 }
 0x5fa   :  { %v1388_v1 = vmul.f32 %v1383_v11, %v1172_v34 }
 0x5fb   :  { %v1393_v2 = vrot.slane %v1378_v23, %v2724_v13 }
 0x5fd   :  { %v1395_v36 = vadd.f32 %v1393_v2, %v1385_v35  ;;  %v1396_v37 = vadd.f32 %v1393_v2, %v1386_v42  ;;  %v1397_v38 = vadd.f32 %v1393_v2, %v1387_v49  ;;  %v1398_v40 = vadd.f32 %v1393_v2, %v1388_v1 }
 0x5ff   :  { %v1399_v41 = vadd.f32 %v2268_v58, %v1395_v36  ;;  %v1400_v61 = vadd.f32 %v2269_v12, %v1396_v37  ;;  %v1401_v16 = vadd.f32 %v2270_v14, %v1397_v38  ;;  %v1402_v19 = vadd.f32 %v2271_v18, %v1398_v40 }
 0x601   :  { %1403 = vst [vmem:[#allocation13] sm:$0xff] %v1399_v41  ;;  %1404 = vst [vmem:[#allocation13 + $0x8] sm:$0xff] %v1400_v61 }
 0x602   :  { %1405 = vst [vmem:[#allocation13 + $0x10] sm:$0xff] %v1401_v16  ;;  %1406 = vst [vmem:[#allocation13 + $0x18] sm:$0xff] %v1402_v19 }
 0x603   :  { %2415 = shalt.err (!%p2412_p10)
}
 0x604   :  { %s2416_s12 = scalar_lea.hbm %s2837_s10, 512 }
 0x605   :  { %p2417_p11 = scmp.ne.s32.totalorder %s2837_s10, %s2416_s12  ;;  %p2420_p12 = scmp.lt.u32.totalorder %s2416_s12, %s2837_s10 }
 0x607   :  { %p2422_p13 = pnand %p2420_p12, %p2417_p11 }
 0x609   :  { %2425 = shalt.err (!%p2422_p13)
}
 0x60a   :  { %1418 = dma.vmem_to_hbm [thread:$0]  %s1413_s3, 512, %s2837_s10, [#allocation4], %s2438_s25, %s2438_s25, %s2439_s26  }
 0x60b   :  { %2434 = dma.done.wait [#allocation4], 512  }
 0x60c   :  { %2435 = vsyncadd [#allocation4], 4294966784 }
 0x60d   :  { %1422 = vsyncpa [#allocation3], 1 }
 0x60e   :  { %1423 = vsyncpa [#allocation6], 1 }
 0x60f   :  { %1424 = vsyncpa [#allocation9], 1 }
 0x610   :  { %1425 = vsyncpa [#allocation12], 1 }
 0x611   :  { %1426 = vsyncpa [#allocation4], 1 }

</bundles_post_ra>
